<compile_context>
chip_gen: v7x
topology: tpu7x:2x2x1
jax: 0.10.0
libtpu: 0.0.40
codegen_flags: <defaults>
</compile_context>

<pallas_src>
import functools

import jax
import jax.numpy as jnp
from jax.experimental import pallas as pl
from jax.experimental.pallas import tpu as pltpu


def _make_divisible(v, divisor, min_value=None):
    if min_value is None:
        min_value = divisor
    new_v = max(min_value, int(v + divisor / 2) // divisor * divisor)
    if new_v < 0.9 * v:
        new_v += divisor
    return new_v


def _se_kernel(x_ref, wr_ref, br_ref, we_ref, be_ref, o_ref, *, inv_hw):
    # x_ref block: [Bt, C, HWp]; weights are small, fully resident, f32.
    x = x_ref[...]
    xf = x.astype(jnp.float32)
    # Global average pool. Padded lanes (beyond the true HW) are zero, so
    # sum * (1/HW) is the exact mean; accumulation is in f32 even for bf16 x.
    pooled = jnp.sum(xf, axis=-1) * inv_hw                               # [Bt, C]
    # Reduce FC (1x1 conv): [Bt, C] @ [C, Cr] + b, then ReLU.
    r = jnp.dot(pooled, wr_ref[...],
                preferred_element_type=jnp.float32) + br_ref[...]        # [Bt, Cr]
    r = jnp.maximum(r, 0.0)
    # Expand FC (1x1 conv): [Bt, Cr] @ [Cr, C] + b.
    e = jnp.dot(r, we_ref[...],
                preferred_element_type=jnp.float32) + be_ref[...]        # [Bt, C]
    # hard_sigmoid gate: relu6(e + 3) / 6
    gate = jnp.clip(e + 3.0, 0.0, 6.0) * (1.0 / 6.0)                     # [Bt, C]
    o_ref[...] = (xf * gate[:, :, None]).astype(o_ref.dtype)


def squeeze_excite(x, w_reduce, b_reduce, w_expand, b_expand,
                   *, vmem_budget_bytes=24 * 1024 * 1024, donate_x=False):
    """x: [B, C, H, W]; weights from the 1x1 convs with spatial dims squeezed."""
    B, C, H, W = x.shape
    HW = H * W
    Cr = w_reduce.shape[0]
    itemsize = jnp.dtype(x.dtype).itemsize

    # Lane-dense spatial axis: pad HW up to a multiple of 128.
    HWp = max(128, ((HW + 127) // 128) * 128)

    # Batch-block size: double-buffered input + output slabs (4x per-slab bytes)
    # must fit the VMEM budget (conservative across v5e/v6e/v7x).
    per_batch_bytes = C * HWp * itemsize
    bt_cap = max(1, vmem_budget_bytes // (4 * per_batch_bytes))
    # Keep at least 2 grid steps when B >= 2 so v7x's two TensorCores both work.
    bt_cap = min(bt_cap, max(1, pl.cdiv(B, 2)))
    Bt = min(B, bt_cap)
    n_steps = pl.cdiv(B, Bt)
    Bp = n_steps * Bt

    x_flat = x.reshape(B, C, HW)
    if HWp != HW or Bp != B:
        x_flat = jnp.pad(x_flat, ((0, Bp - B), (0, 0), (0, HWp - HW)))

    f32 = jnp.float32
    wr_t = w_reduce.astype(f32).T              # [C, Cr]
    we_t = w_expand.astype(f32).T              # [Cr, C]
    br = b_reduce.astype(f32).reshape(1, Cr)
    be = b_expand.astype(f32).reshape(1, C)

    slab_bytes = Bt * per_batch_bytes
    weight_bytes = (wr_t.size + we_t.size + br.size + be.size) * 4
    vmem_limit = int(min(48 * 1024 * 1024,
                         max(16 * 1024 * 1024,
                             4 * slab_bytes + 4 * weight_bytes + (2 << 20))))

    kernel = functools.partial(_se_kernel, inv_hw=1.0 / HW)

    out_flat = pl.pallas_call(
        kernel,
        out_shape=jax.ShapeDtypeStruct((Bp, C, HWp), x.dtype),
        grid=(n_steps,),
        in_specs=[
            pl.BlockSpec((Bt, C, HWp), lambda b: (b, 0, 0)),   # x slab (Bt batches)
            pl.BlockSpec((C, Cr), lambda b: (0, 0)),           # W_reduce^T
            pl.BlockSpec((1, Cr), lambda b: (0, 0)),           # b_reduce
            pl.BlockSpec((Cr, C), lambda b: (0, 0)),           # W_expand^T
            pl.BlockSpec((1, C), lambda b: (0, 0)),            # b_expand
        ],
        out_specs=pl.BlockSpec((Bt, C, HWp), lambda b: (b, 0, 0)),
        compiler_params=pltpu.CompilerParams(
            dimension_semantics=("parallel",),
            vmem_limit_bytes=vmem_limit),
        input_output_aliases=({0: 0} if donate_x else {}),
    )(x_flat, wr_t, br, we_t, be)

    return out_flat[:B, :, :HW].reshape(B, C, H, W)


def _reference(x, w_reduce, b_reduce, w_expand, b_expand):
    xf = x.astype(jnp.float32)
    pooled = jnp.mean(xf, axis=(2, 3))                                    # [B, C]
    r = jnp.maximum(pooled @ w_reduce.astype(jnp.float32).T + b_reduce, 0.0)
    e = r @ w_expand.astype(jnp.float32).T + b_expand
    gate = jnp.clip(e + 3.0, 0.0, 6.0) / 6.0
    return (xf * gate[:, :, None, None]).astype(x.dtype)


def _run_case(key, B, C, H, W, dtype=jnp.float32):
    se_ratio, divisor = 0.25, 4
    Cr = _make_divisible(C * se_ratio, divisor)

    kx, k1, k2, k3, k4 = jax.random.split(key, 5)
    x = jax.random.normal(kx, (B, C, H, W), dtype=jnp.float32).astype(dtype)
    w_reduce = jax.random.normal(k1, (Cr, C), dtype=jnp.float32) * 0.1
    b_reduce = jax.random.normal(k2, (Cr,), dtype=jnp.float32) * 0.1
    w_expand = jax.random.normal(k3, (C, Cr), dtype=jnp.float32) * 0.1
    b_expand = jax.random.normal(k4, (C,), dtype=jnp.float32) * 0.1

    out = squeeze_excite(x, w_reduce, b_reduce, w_expand, b_expand)
    out = jax.block_until_ready(out)
    ref = _reference(x, w_reduce, b_reduce, w_expand, b_expand)
    assert out.shape == (B, C, H, W)
    tol = 1e-5 if dtype == jnp.float32 else 2e-2
    assert jnp.allclose(out.astype(jnp.float32), ref.astype(jnp.float32),
                        atol=tol, rtol=tol), "mismatch vs reference"


if __name__ == "__main__":
    key = jax.random.PRNGKey(0)
    k0, k1 = jax.random.split(key)
    # Primary small test (HW already a multiple of 128).
    _run_case(k0, B=2, C=8, H=16, W=16, dtype=jnp.float32)
    # Non-multiple-of-128 spatial + non-divisible batch (exercises padding path).
    _run_case(k1, B=3, C=16, H=7, W=7, dtype=jnp.float32)
    print("KERNEL_OK")
</pallas_src>

<mosaic_0001>
module attributes {stable_mosaic.version = 11 : i64} {
  func.func @_se_kernel(%arg0: i32, %arg1: memref<1x8x256xf32, #tpu.memory_space<vmem>>, %arg2: memref<8x4xf32, #tpu.memory_space<vmem>>, %arg3: memref<1x4xf32, #tpu.memory_space<vmem>>, %arg4: memref<4x8xf32, #tpu.memory_space<vmem>>, %arg5: memref<1x8xf32, #tpu.memory_space<vmem>>, %arg6: memref<1x8x256xf32, #tpu.memory_space<vmem>>) attributes {dimension_semantics = [#tpu.dimension_semantics<parallel>], iteration_bounds = array<i64: 2>, scalar_prefetch = 0 : i64, scratch_operands = 0 : i64, tpu.core_type = #tpu.core_type<tc>, window_params = [{transform_indices = @transform_0, window_bounds = array<i64: 1, 8, 256>}, {pipeline_mode = #tpu.pipeline_mode<synchronous>, transform_indices = @transform_1, window_bounds = array<i64: 8, 4>}, {pipeline_mode = #tpu.pipeline_mode<synchronous>, transform_indices = @transform_2, window_bounds = array<i64: 1, 4>}, {pipeline_mode = #tpu.pipeline_mode<synchronous>, transform_indices = @transform_3, window_bounds = array<i64: 4, 8>}, {pipeline_mode = #tpu.pipeline_mode<synchronous>, transform_indices = @transform_4, window_bounds = array<i64: 1, 8>}, {transform_indices = @transform_5, window_bounds = array<i64: 1, 8, 256>}]} {
    %c0 = arith.constant 0 : index
    %c0_0 = arith.constant 0 : index
    %c0_1 = arith.constant 0 : index
    %0 = vector.load %arg1[%c0, %c0_0, %c0_1] : memref<1x8x256xf32, #tpu.memory_space<vmem>>, vector<1x8x256xf32>
    %cst = arith.constant dense<0.000000e+00> : vector<1x8xf32>
    %1 = vector.multi_reduction <add>, %0, %cst [2] : vector<1x8x256xf32> to vector<1x8xf32>
    %cst_2 = arith.constant 3.906250e-03 : f32
    %2 = vector.broadcast %cst_2 : f32 to vector<1x8xf32>
    %3 = arith.mulf %1, %2 : vector<1x8xf32>
    %c0_3 = arith.constant 0 : index
    %c0_4 = arith.constant 0 : index
    %4 = vector.load %arg2[%c0_3, %c0_4] : memref<8x4xf32, #tpu.memory_space<vmem>>, vector<8x4xf32>
    %cst_5 = arith.constant dense<0.000000e+00> : vector<1x4xf32>
    %5 = tpu.matmul %3, %4, %cst_5 {dimension_numbers = #tpu.dot_dimension_numbers<[1], [0], [0], [1], [0, 0, 1, 1], [], []>} : vector<1x8xf32>, vector<8x4xf32>, vector<1x4xf32> -> vector<1x4xf32>
    %c0_6 = arith.constant 0 : index
    %c0_7 = arith.constant 0 : index
    %6 = vector.load %arg3[%c0_6, %c0_7] : memref<1x4xf32, #tpu.memory_space<vmem>>, vector<1x4xf32>
    %7 = arith.addf %5, %6 : vector<1x4xf32>
    %cst_8 = arith.constant 0.000000e+00 : f32
    %8 = vector.broadcast %cst_8 : f32 to vector<1x4xf32>
    %9 = arith.maximumf %7, %8 : vector<1x4xf32>
    %c0_9 = arith.constant 0 : index
    %c0_10 = arith.constant 0 : index
    %10 = vector.load %arg4[%c0_9, %c0_10] : memref<4x8xf32, #tpu.memory_space<vmem>>, vector<4x8xf32>
    %cst_11 = arith.constant dense<0.000000e+00> : vector<1x8xf32>
    %11 = tpu.matmul %9, %10, %cst_11 {dimension_numbers = #tpu.dot_dimension_numbers<[1], [0], [0], [1], [0, 0, 1, 1], [], []>} : vector<1x4xf32>, vector<4x8xf32>, vector<1x8xf32> -> vector<1x8xf32>
    %c0_12 = arith.constant 0 : index
    %c0_13 = arith.constant 0 : index
    %12 = vector.load %arg5[%c0_12, %c0_13] : memref<1x8xf32, #tpu.memory_space<vmem>>, vector<1x8xf32>
    %13 = arith.addf %11, %12 : vector<1x8xf32>
    %cst_14 = arith.constant 3.000000e+00 : f32
    %14 = vector.broadcast %cst_14 : f32 to vector<1x8xf32>
    %15 = arith.addf %13, %14 : vector<1x8xf32>
    %cst_15 = arith.constant 0.000000e+00 : f32
    %cst_16 = arith.constant 6.000000e+00 : f32
    %16 = vector.broadcast %cst_15 : f32 to vector<1x8xf32>
    %17 = arith.maximumf %16, %15 : vector<1x8xf32>
    %18 = vector.broadcast %cst_16 : f32 to vector<1x8xf32>
    %19 = arith.minimumf %18, %17 : vector<1x8xf32>
    %cst_17 = arith.constant 0.166666672 : f32
    %20 = vector.broadcast %cst_17 : f32 to vector<1x8xf32>
    %21 = arith.mulf %19, %20 : vector<1x8xf32>
    %22 = vector.shape_cast %21 : vector<1x8xf32> to vector<1x8x1xf32>
    %23 = vector.broadcast %22 : vector<1x8x1xf32> to vector<1x8x256xf32>
    %24 = arith.mulf %0, %23 : vector<1x8x256xf32>
    %c0_18 = arith.constant 0 : index
    %c0_19 = arith.constant 0 : index
    %c0_20 = arith.constant 0 : index
    %25 = vector.load %arg6[%c0_18, %c0_19, %c0_20] : memref<1x8x256xf32, #tpu.memory_space<vmem>>, vector<1x8x256xf32>
    tpu.vector_store %arg6[%c0_18, %c0_19, %c0_20], %24 {strides = array<i32>} : memref<1x8x256xf32, #tpu.memory_space<vmem>>, vector<1x8x256xf32>,
    return
  }
  func.func @transform_0(%arg0: i32) -> (i32, i32, i32) {
    %c0_i32 = arith.constant 0 : i32
    %c0_i32_0 = arith.constant 0 : i32
    %c0_i32_1 = arith.constant 0 : i32
    return %arg0, %c0_i32, %c0_i32_0 : i32, i32, i32
  }
  func.func @transform_1(%arg0: i32) -> (i32, i32) {
    %c0_i32 = arith.constant 0 : i32
    %c0_i32_0 = arith.constant 0 : i32
    %c0_i32_1 = arith.constant 0 : i32
    return %c0_i32, %c0_i32_0 : i32, i32
  }
  func.func @transform_2(%arg0: i32) -> (i32, i32) {
    %c0_i32 = arith.constant 0 : i32
    %c0_i32_0 = arith.constant 0 : i32
    %c0_i32_1 = arith.constant 0 : i32
    return %c0_i32, %c0_i32_0 : i32, i32
  }
  func.func @transform_3(%arg0: i32) -> (i32, i32) {
    %c0_i32 = arith.constant 0 : i32
    %c0_i32_0 = arith.constant 0 : i32
    %c0_i32_1 = arith.constant 0 : i32
    return %c0_i32, %c0_i32_0 : i32, i32
  }
  func.func @transform_4(%arg0: i32) -> (i32, i32) {
    %c0_i32 = arith.constant 0 : i32
    %c0_i32_0 = arith.constant 0 : i32
    %c0_i32_1 = arith.constant 0 : i32
    return %c0_i32, %c0_i32_0 : i32, i32
  }
  func.func @transform_5(%arg0: i32) -> (i32, i32, i32) {
    %c0_i32 = arith.constant 0 : i32
    %c0_i32_0 = arith.constant 0 : i32
    %c0_i32_1 = arith.constant 0 : i32
    return %arg0, %c0_i32, %c0_i32_0 : i32, i32, i32
  }
}

</mosaic_0001>

<bundles_post_ra>
// kernel: tpu_custom_call.1
= control target key start
LH: loop header
LB: loop body
LE: loop exit
PB: predicated region body
PF: predicated region fallthrough
CT: control target
= control target key end

     0   :  { %10 = vsyncpa [#allocation3], 0  ;;  %s900_s0 = inlined_call_operand.hbm [shape: f32[2,8,256], index: 0, kind: input, shape index: {}]   ;;  %s901_s1 = inlined_call_operand.vmem [shape: f32[8,4], index: 1, kind: input, shape index: {}]   ;;  %s902_s2 = inlined_call_operand.vmem [shape: f32[1,4], index: 2, kind: input, shape index: {}]   ;;  %s903_s3 = inlined_call_operand.vmem [shape: f32[4,8], index: 3, kind: input, shape index: {}]   ;;  %s904_s4 = inlined_call_operand.vmem [shape: f32[1,8], index: 4, kind: input, shape index: {}]   ;;  %s905_s5 = inlined_call_operand.hbm [shape: f32[2,8,256], index: 5, kind: output, shape index: {}]  }
   0x1   :  { %12 = vsyncpa [#allocation3 + $0x1], 0 }
   0x2   :  { %13 = vsyncpa [#allocation4], 0 }
   0x3   :  { %15 = vsyncpa [#allocation4 + $0x1], 0  ;;  %s723_s18 = smov 0   ;;  %s725_s19 = smov 0  }
   0x4   :  { %s727_s20 = smov 0   ;;  %s729_s21 = smov 0  }
   0x5 LB: > { %s744_s22 = sadd.s32 4294967295, %s687_s21   ;;  %s510_s23 = sadd.s32 4294967294, %s687_s21   ;;  %s687_s21 = sphi %s729_s21, %s920_s21   ;;  %s683_s20 = sphi %s727_s20, %s919_s20   ;;  %s679_s19 = sphi %s725_s19, %s918_s19   ;;  %s675_s18 = sphi %s723_s18, %s917_s18  }
   0x6   : > { %s748_s24 = sadd.s32 1, %s687_s21   ;;  %s28_s25 = sadd.s32 1, %s683_s20 }
   0x7   : > { %s25_s26 = ssub.s32 %s687_s21, %s748_s24  ;;  %p35_p0 = scmp.ne.s32.totalorder %s683_s20, %s679_s19 }
   0x8   : > { %p26_p1 = scmp.eq.s32.totalorder %s25_s26, 0  ;;  %p36_p2 = scmp.eq.s32.totalorder %s687_s21, 0 }
   0x9   : > { %p41_p3 = scmp.ne.s32.totalorder %s679_s19, %s675_s18  ;;  %p42_p4 = scmp.eq.s32.totalorder %s744_s22, 0 }
   0xa   : > { %s760_s27 = scalar_select %p26_p1, %s683_s20, %s28_s25  }
   0xb   : > { %p762_p5 = por %p36_p2, %p35_p0  ;;  %p766_p6 = por %p42_p4, %p41_p3 }
   0xc   : > { %p149_p7 = scmp.eq.s32.totalorder %s744_s22, 1  ;;  %p155_p8 = scmp.eq.s32.totalorder %s510_s23, 1 }
   0xd   : > { %p555_p10 = scmp.lt.s32.totalorder %s687_s21, 2  ;;  %s187_s7 = sand.u32 1, %s683_s20  }
   0xe   : > { %p773_p11 = por %p149_p7, %p35_p0  ;;  %p777_p12 = por %p155_p8, %p41_p3 }
   0xf   : > { %s527_s8 = sshll.u32 %s687_s21, 8  ;;  %s513_s9 = sshll.u32 %s187_s7, 4 }
  0x10   : > { %s909_s30 = scalar_select %p773_p11, 1, 0 }
  0x11   : > { %s910_s6 = scalar_select %p777_p12, 1, 0 }
  0x12   : > { %s786_s12 = scalar_lea.hbm %s900_s0, %s527_s8  ;;  %s191_s13 = scalar_lea.vmem [#allocation2], %s513_s9 }
  0x13   : > { %s199_s14 = sshll.u32 %s191_s13, 4  ;;  %p790_p13 = pnand %p555_p10, %p762_p5  ;;  %s794_s14 = int_to_ptr.vmem [resolvable:$true] %s199_s14 }
  0x14   : > { %s188_s16 = scalar_lea.sflag [#allocation3], %s187_s7  ;;  %s591_s17 = scalar_lea.hbm %s786_s12, 256 }
  0x15   : > { %p592_p2 = scmp.ne.s32.totalorder %s786_s12, %s591_s17  ;;  %p593_p3 = pneg %p790_p13 }
  0x16   : > { %s596_s26 = scalar_lea.hbm %s900_s0, 512  ;;  %p597_p5 = scmp.lt.u32.totalorder %s786_s12, %s900_s0 }
  0x17   : > { %p594_p4 = pnand %p593_p3, %p592_p2  ;;  %p598_p8 = scmp.lt.u32.totalorder %s596_s26, %s591_s17 }
  0x18   : > { %p600_p9 = scmp.lt.u32.totalorder %s591_s17, %s786_s12 }
  0x19   : > { %p595_p7 = pneg %p594_p4  ;;  %p599_p10 = por %p598_p8, %p597_p5 }
  0x1b   : > { %p601_p0 = por %p600_p9, %p599_p10 }
  0x1d   : > { %p602_p1 = pnand %p601_p0, %p595_p7 }
  0x1f   : > { %605 = shalt.err (!%p602_p1)
}
  0x20   : > { %s606_s7 = scalar_lea.vmem %s794_s14, 256  ;;  %s689_s9 = smov [#allocation2]  }
  0x21   : > { %p607_p2 = scmp.ne.s32.totalorder %s794_s14, %s606_s7  ;;  %s611_s10 = sshll.u32 %s689_s9, 4  ;;  %s612_s10 = int_to_ptr.vmem [resolvable:$false] %s611_s10 }
  0x22   : > { %s613_s11 = scalar_lea.vmem %s612_s10, 512  ;;  %p614_p11 = scmp.lt.s32.totalorder %s794_s14, %s612_s10 }
  0x23   : > { %p609_p4 = pnand %p607_p2, %p593_p3  ;;  %p615_p5 = scmp.lt.s32.totalorder %s613_s11, %s606_s7 }
  0x25   : > { %p610_p12 = pneg %p609_p4  ;;  %p616_p8 = por %p615_p5, %p614_p11 }
  0x27   : > { %p617_p9 = pnand %p616_p8, %p610_p12 }
  0x29   : > { %620 = shalt.err (!%p617_p9)
}
  0x2a   : > { %550 = dma.hbm_to_vmem [thread:$0]  (!%p790_p13), %s786_s12, 256, %s794_s14, %s188_s16  }
  0x2b   : > { %p912_p0 = scmp.lt.s32.totalorder %s687_s21, 3  ;;  %p913_p1 = scmp.ge.s32.totalorder %s687_s21, 1 }
  0x2d   : > { %p205_p3 = pnand %p913_p1, %p912_p0 }
  0x2e   : > { %s828_s13 = sand.u32 (!%p205_p3), 1, %s679_s19  }
  0x2f   : > { %208 = sbr.rel (%p205_p3) target bundleno = 775 (0x307), region = 40  ;;  %s517_s17 = sshll.u32 (!%p205_p3), %s828_s13, 4 }
  0x30   : > { %s211_s23 = scalar_lea.sflag (!%p205_p3), [#allocation3], %s828_s13  ;;  %s214_s15 = scalar_lea.vmem (!%p205_p3), [#allocation2], %s517_s17 }
  0x36   : > { %666 = dma.done.wait (%p766_p6), %s211_s23, 256  }
  0x37   : > { %668 = vsyncadd (%p766_p6), %s211_s23, 4294967040  ;;  %v241_v0 = vld [vmem:[%s214_s15] sm:$0xff]  ;;  %v242_v1 = vld [vmem:[%s214_s15 + $0x8] sm:$0xff]  ;;  %v690_v3 = vmov 0.0   ;;  %vm691_vm0 = vmmov 0   ;;  %v250_v5 = vlaneseq  ;;  %vm256_vm1 = vcmask 64512  }
  0x38   : > { %v243_v2 = vadd.f32 %v242_v1, %v241_v0  ;;  %533 = vmatprep.subr.mxu0 %v690_v3  ;;  %v247_v4 = vld [vmem:[%s901_s1] sm:$0xff]  ;;  %538 = vmatprep.subr.mxu1 %v690_v3  ;;  %vm336_vm2 = vcmask 1043456   ;;  %vm332_vm3 = vcmask 31744   ;;  %s528_s7 = sshll.u32 %s744_s22, 8  ;;  %s240_s9 = scalar_lea.vmem [#allocation5], %s517_s17 }
  0x39   : > { %534 = vmatpush3.msra.mxu0 %v247_v4  ;;  %535 = vmatprep.mubr.msk.f32.mxu0 %vm691_vm0, %v690_v3  ;;  %v251_v6 = vand.u32 127, %v250_v5  ;;  %v253_v7 = vshrl.u32 %v250_v5, 7  ;;  %v330_v12 = vld [vmem:[%s903_s3] sm:$0xf]  ;;  %s440_s10 = sshll.u32 %s240_s9, 4  ;;  %s856_s15 = scalar_lea.hbm %s905_s5, %s528_s7  ;;  %s858_s10 = int_to_ptr.vmem [resolvable:$true] %s440_s10 }
  0x3a   : > { %244 = vadd.xlane.f32.xlu0 %v243_v2  ;;  %540 = vmatprep.mubr.msk.f32.mxu1 %vm691_vm0, %v690_v3  ;;  %v248_v13 = vld [vmem:[%s902_s2] sm:$0x1]  ;;  %s426_s12 = scalar_lea.sflag [#allocation4], %s828_s13  ;;  %s621_s22 = scalar_lea.vmem %s858_s10, 256 }
  0x3b   : > { %v254_v8 = vsub.s32 %v251_v6, %v253_v7  ;;  %539 = vmatpush3.msk.msra.mxu1 %vm336_vm2, %v330_v12  ;;  %v331_v18 = vld [vmem:[%s904_s4] sm:$0x1]  ;;  %v416_v25 = vsub.s32 0, %v253_v7  ;;  %p622_p6 = scmp.ne.s32.totalorder %s858_s10, %s621_s22  ;;  %p914_p11 = scmp.ne.s32.totalorder %s909_s30, 0 }
  0x3c   : > { %s692_s17 = smov [#allocation5]  }
  0x3d   : > { %p623_p12 = pnand %p622_p6, %p914_p11  ;;  %s625_s14 = sshll.u32 %s692_s17, 4  ;;  %s626_s14 = int_to_ptr.vmem [resolvable:$false] %s625_s14 }
  0x3e   : > { %s627_s29 = scalar_lea.vmem %s626_s14, 512  ;;  %p628_p7 = scmp.lt.s32.totalorder %s858_s10, %s626_s14 }
  0x3f   : > { %p624_p13 = pneg %p623_p12  ;;  %p629_p10 = scmp.lt.s32.totalorder %s627_s29, %s621_s22 }
  0x41   : > { %p630_p2 = por %p629_p10, %p628_p7 }
  0x43   : > { %p631_p4 = pnand %p630_p2, %p624_p13 }
  0xc7   : > { %v245_v9 = vpop.xlane.xlu0 %244 }
  0xc8   : > { %v246_v10 = vmul.f32 0.00390625, %v245_v9 }
  0xca   : > { %v255_v11 = vrot.slane %v246_v10, %v254_v8 }
  0xcc   : > { %536 = vmatmul.mubr.msk.f32.vlgmr.msra.gmra.mrb[0].mxu0 %vm256_vm1, %v255_v11 }
 0x19f   : > { %v325_v14 = vpop.f32.mrb[0].mxu0 }
 0x1a0   : > { %v326_v15 = vadd.f32 %v325_v14, %v248_v13  ;;  %v537_v16 = vpop.f32.mrb[1].mxu0 }
 0x1a2   : > { %v329_v17 = vmax.f32 %v326_v15, 0.0 }
 0x1a4   : > { %541 = vmatmul.mubr.msk.f32.vlgmr.msra.gmra.mrb[0].mxu1 %vm332_vm3, %v329_v17 }
 0x277   : > { %v406_v19 = vpop.f32.mrb[0].mxu1 }
 0x278   : > { %v407_v20 = vadd.f32 %v406_v19, %v331_v18  ;;  %v542_v21 = vpop.f32.mrb[1].mxu1 }
 0x27a   : > { %v410_v22 = vadd.f32 3.0, %v407_v20 }
 0x27c   : > { %v411_v23 = vmax.f32 %v410_v22, 0.0 }
 0x27e   : > { %v412_v24 = vmin.f32 %v411_v23, 6.0 }
 0x280   : > { %v413_v26 = vmul.f32 0.16666667, %v412_v24 }
 0x282   : > { %v417_v27 = vrot.slane %v413_v26, %v416_v25 }
 0x284   : > { %419 = vbcast.lane.b32.xlu0 %v417_v27, 256 }
 0x2f6   : > { %v420_v28 = vpop.permute.xlu0 %419 }
 0x2f7   : > { %v421_v29 = vmul.f32 %v420_v28, %v241_v0  ;;  %v422_v30 = vmul.f32 %v420_v28, %v242_v1 }
 0x2f9   : > { %423 = vst [vmem:[%s240_s9] sm:$0xff] %v421_v29  ;;  %424 = vst [vmem:[%s240_s9 + $0x8] sm:$0xff] %v422_v30 }
 0x2fa   : > { %634 = shalt.err (!%p631_p4)
}
 0x2fb   : > { %s635_s13 = scalar_lea.hbm %s856_s15, 256  ;;  %s639_s26 = scalar_lea.hbm %s905_s5, 512 }
 0x2fc   : > { %p636_p5 = scmp.ne.s32.totalorder %s856_s15, %s635_s13  ;;  %p640_p0 = scmp.lt.u32.totalorder %s856_s15, %s905_s5 }
 0x2fd   : > { %p641_p1 = scmp.lt.u32.totalorder %s639_s26, %s635_s13  ;;  %p643_p6 = scmp.lt.u32.totalorder %s635_s13, %s856_s15 }
 0x2fe   : > { %p637_p8 = pnand %p636_p5, %p914_p11 }
 0x2ff   : > { %p642_p3 = por %p641_p1, %p640_p0 }
 0x300   : > { %p638_p9 = pneg %p637_p8 }
 0x301   : > { %p644_p12 = por %p643_p6, %p642_p3 }
 0x303   : > { %p645_p13 = pnand %p644_p12, %p638_p9 }
 0x305   : > { %648 = shalt.err (!%p645_p13)
}
 0x306   : > { %545 = dma.vmem_to_hbm [thread:$0]  (%p914_p11), %s858_s10, 256, %s856_s15, %s426_s12  }
 0x307 PF: > { %s452_s7 = sand.u32 1, %s675_s18   ;;  %p915_p7 = scmp.ne.s32.totalorder %s910_s6, 0 }
 0x308   : > { %p916_p10 = scmp.ge.s32.totalorder %s687_s21, 2  ;;  %s453_s9 = scalar_lea.sflag [#allocation4], %s452_s7 }
 0x30a   : > { %p552_p2 = pnand %p916_p10, %p915_p7 }
 0x30c   : > { %670 = dma.done.wait (!%p552_p2), %s453_s9, 256  }
 0x30d   : > { %672 = vsyncadd (!%p552_p2), %s453_s9, 4294967040  ;;  %p18_p4 = scmp.ge.s32.totalorder %s748_s24, 4   ;;  %s917_s18 = smov %s679_s19 }
 0x30e   : > { %s918_s19 = smov %s683_s20  ;;  %s919_s20 = smov %s760_s27 }
 0x30f   : > { %s920_s21 = smov %s748_s24  ;;  %20 = sbr.rel (!%p18_p4) target bundleno = 5 (0x5), region = 85 }
 0x316   :  { %458 = vsyncpa [#allocation3], 1 }
 0x317   :  { %460 = vsyncpa [#allocation3 + $0x1], 1 }
 0x318   :  { %461 = vsyncpa [#allocation4], 1 }
 0x319   :  { %463 = vsyncpa [#allocation4 + $0x1], 1 }

</bundles_post_ra>
